<compile_context>
chip_gen: v7x
topology: tpu7x:2x2x1
jax: 0.10.0
libtpu: 0.0.40
codegen_flags: <defaults>
</compile_context>

<pallas_src>
import functools

import jax
import jax.numpy as jnp
from jax import lax
from jax.experimental import pallas as pl
from jax.experimental.pallas import tpu as pltpu

_LANE = 128
_MIB = 1024 * 1024


def _kl_kernel(p_ref, q_ref, out_ref, acc_ref, *,
               n_rows, batch, q_dim0, tiles_per_core, covered_rows):
    """One (tile_rows, V) row-tile per grid step; (8, V) partial-sum accumulator."""
    c = pl.program_id(0)          # core / parallel axis
    g = pl.program_id(1)          # reduction axis (arbitrary)
    tile_rows, v = p_ref.shape

    @pl.when(g == 0)
    def _():
        acc_ref[...] = jnp.zeros_like(acc_ref)

    p = p_ref[...].astype(jnp.float32)   # (tile_rows, V)
    q = q_ref[...].astype(jnp.float32)   # (tile_rows, V)

    # argmax(p_row, -1) != 0 (first-index tie-breaking)  <=>  max(p_row) > p_row[0]
    pmax = jnp.max(p, axis=-1, keepdims=True)            # lane reduce, (tile_rows, 1)
    keep = pmax > p[:, 0:1]                               # bool (tile_rows, 1)

    need_row_mask = covered_rows != n_rows                # partial / phantom tiles
    need_col_mask = q_dim0 < batch                        # module's j-loop bound
    if need_row_mask or need_col_mask:
        tile_idx = c * tiles_per_core + g
        rows = tile_idx * tile_rows + lax.broadcasted_iota(
            jnp.int32, (tile_rows, 1), 0)
        if need_row_mask:
            keep = jnp.logical_and(keep, rows < n_rows)
        if need_col_mask:
            keep = jnp.logical_and(keep, lax.rem(rows, batch) < q_dim0)

    # KL elementwise term (two f32 logs; a log-of-ratio rewrite does not reduce
    # EUP pushes, so the exact formula is kept).
    kl = q * (jnp.log(q) - jnp.log(p))
    masked = jnp.where(keep, kl, 0.0)      # select, never mask-multiply

    if tile_rows % 8 == 0 and v % _LANE == 0:
        # Fold row groups with whole-vreg adds; no per-step cross-sublane reduce.
        acc_ref[...] += masked.reshape(tile_rows // 8, 8, v).sum(axis=0)
    else:
        acc_ref[0:1, :] += jnp.sum(masked, axis=0, keepdims=True)

    @pl.when(g == pl.num_programs(1) - 1)
    def _():
        total = jnp.sum(acc_ref[...])                      # collapse once, in epilogue
        out_ref[...] = jnp.broadcast_to(total, out_ref.shape).astype(jnp.float32)


def _pick_row_tile(n_rows, n_cols, itemsize, target_bytes):
    """Rows per block: sized by bytes, aligned to 8 (16 for 2-byte dtypes)."""
    row_bytes = max(1, n_cols * itemsize)
    rows = max(1, target_bytes // row_bytes)
    if rows >= n_rows:
        return int(n_rows)            # single full-extent block (always legal)
    align = 16 if itemsize == 2 else 8
    rows = max(align, (rows // align) * align)
    return int(rows)


def multinomial_kl_divergence_loss(p_proba, q_proba):
    T, B, V = p_proba.shape
    q_dim0 = q_proba.shape[0]
    n_rows = T * B
    inv_denom = 1.0 / float(B * T)    # p_proba.size(1) * p_proba.size(0)

    # Contiguous reshape (T, B, V) -> (T*B, V); no data movement.
    p2 = p_proba.reshape(n_rows, V)
    q2 = q_proba.reshape(n_rows, V)

    itemsize = jnp.dtype(p_proba.dtype).itemsize

    # Per-generation block sizing: ~8 MiB/input on 128-MiB-VMEM chips (v5e/v6e),
    # ~5 MiB on v7x (64 MiB physical VMEM).
    try:
        vmem_cap = int(pltpu.get_tpu_info().vmem_capacity_bytes)
    except Exception:
        vmem_cap = 64 * _MIB          # conservative (v7x) fallback
    target_block_bytes = min(8 * _MIB, vmem_cap // 12)

    tile_rows = _pick_row_tile(n_rows, V, itemsize, target_block_bytes)
    total_tiles = pl.cdiv(n_rows, tile_rows)
    num_cores = 2 if total_tiles >= 2 else 1     # engages the 2nd TC on v7x
    tiles_per_core = pl.cdiv(total_tiles, num_cores)
    covered_rows = num_cores * tiles_per_core * tile_rows

    # Explicit VMEM budget for the chosen blocks (2 inputs x 2 buffers + acc + headroom).
    pad_rows = -(-tile_rows // 16) * 16
    pad_cols = -(-V // _LANE) * _LANE
    block_bytes = pad_rows * pad_cols * itemsize
    acc_bytes = 8 * pad_cols * 4
    vmem_limit = int(min(vmem_cap,
                         max(16 * _MIB, 2 * 2 * block_bytes + acc_bytes + 4 * _MIB)))

    def in_index_map(c, g):
        t = c * tiles_per_core + g
        if num_cores * tiles_per_core != total_tiles:
            # Phantom trailing tiles are clamped to the last real tile; their rows
            # are masked out in-kernel (rows >= n_rows), so they contribute zero.
            t = jnp.minimum(t, total_tiles - 1)
        return (t, 0)

    kernel = functools.partial(
        _kl_kernel,
        n_rows=n_rows, batch=B, q_dim0=q_dim0,
        tiles_per_core=tiles_per_core, covered_rows=covered_rows)

    cost = pl.CostEstimate(
        flops=6 * n_rows * V,
        transcendentals=2 * n_rows * V,
        bytes_accessed=2 * n_rows * V * itemsize)

    out = pl.pallas_call(
        kernel,
        out_shape=jax.ShapeDtypeStruct((num_cores, 8, _LANE), jnp.float32),
        grid_spec=pltpu.PrefetchScalarGridSpec(
            num_scalar_prefetch=0,
            grid=(num_cores, tiles_per_core),
            in_specs=[
                pl.BlockSpec((tile_rows, V), in_index_map),
                pl.BlockSpec((tile_rows, V), in_index_map),
            ],
            out_specs=pl.BlockSpec((1, 8, _LANE), lambda c, g: (c, 0, 0)),
            scratch_shapes=[pltpu.VMEM((8, V), jnp.float32)],
        ),
        compiler_params=pltpu.CompilerParams(
            dimension_semantics=("parallel", "arbitrary"),
            vmem_limit_bytes=vmem_limit,
        ),
        cost_estimate=cost,
    )(p2, q2)

    partials = out[:, 0, 0]                       # one partial sum per core
    return jnp.sum(partials) * jnp.float32(inv_denom)


def _reference(p, q):
    """Pure-JAX reference mirroring the PyTorch module."""
    T, B, V = p.shape
    p32 = p.astype(jnp.float32)
    q32 = q.astype(jnp.float32)
    topi = jnp.argmax(p32, axis=-1)                      # (T, B)
    mask = (topi != 0).astype(jnp.float32)               # (T, B)
    j_idx = jnp.arange(B)[None, :]
    mask = jnp.where(j_idx < q.shape[0], mask, 0.0)
    loss = q32 * (jnp.log(q32) - jnp.log(p32))
    return jnp.sum(mask[..., None] * loss) / (B * T)


if __name__ == "__main__":
    key = jax.random.PRNGKey(0)

    # Main case: (seq, batch, vocab).
    T, B, V = 8, 4, 32
    k1, k2, k3, k4 = jax.random.split(key, 4)
    p_proba = jax.nn.softmax(jax.random.normal(k1, (T, B, V), dtype=jnp.float32), axis=-1)
    q_proba = jax.nn.softmax(jax.random.normal(k2, (T, B, V), dtype=jnp.float32), axis=-1)

    loss = jax.block_until_ready(multinomial_kl_divergence_loss(p_proba, q_proba))
    ref = jax.block_until_ready(_reference(p_proba, q_proba))
    assert jnp.allclose(loss, ref, rtol=1e-5, atol=1e-6), (loss, ref)

    # Tie case: uniform rows -> argmax == 0 (first-index tie-break) -> fully masked.
    p_tie = jnp.full((1, 1, 8), 0.125, dtype=jnp.float32)
    q_tie = jax.nn.softmax(jax.random.normal(k3, (1, 1, 8), dtype=jnp.float32), axis=-1)
    loss_tie = jax.block_until_ready(multinomial_kl_divergence_loss(p_tie, q_tie))
    assert jnp.allclose(loss_tie, 0.0, atol=1e-7), loss_tie

    # Column-mask case: q.size(0) < p.size(1) leaves trailing batch columns at 0.
    T2, B2, V2 = 2, 8, 16
    p_c = jax.nn.softmax(jax.random.normal(k4, (T2, B2, V2), dtype=jnp.float32), axis=-1)
    q_c = jax.nn.softmax(jax.random.normal(k2, (T2, B2, V2), dtype=jnp.float32), axis=-1)
    loss_c = jax.block_until_ready(multinomial_kl_divergence_loss(p_c, q_c))
    ref_c = jax.block_until_ready(_reference(p_c, q_c))
    assert jnp.allclose(loss_c, ref_c, rtol=1e-5, atol=1e-6), (loss_c, ref_c)

    print("KERNEL_OK")
</pallas_src>

<mosaic_0001>
module attributes {stable_mosaic.version = 11 : i64} {
  func.func @_kl_kernel(%arg0: i32, %arg1: i32, %arg2: memref<32x32xf32, #tpu.memory_space<vmem>>, %arg3: memref<32x32xf32, #tpu.memory_space<vmem>>, %arg4: memref<1x8x128xf32, #tpu.memory_space<vmem>>, %arg5: memref<8x32xf32, #tpu.memory_space<vmem>>) attributes {dimension_semantics = [#tpu.dimension_semantics<parallel>, #tpu.dimension_semantics<arbitrary>], iteration_bounds = array<i64: 1, 1>, scalar_prefetch = 0 : i64, scratch_operands = 1 : i64, tpu.core_type = #tpu.core_type<tc>, window_params = [{transform_indices = @transform_0, window_bounds = array<i64: 32, 32>}, {transform_indices = @transform_1, window_bounds = array<i64: 32, 32>}, {transform_indices = @transform_2, window_bounds = array<i64: 1, 8, 128>}]} {
    %c0_i32 = arith.constant 0 : i32
    %0 = arith.cmpi eq, %arg1, %c0_i32 : i32
    %1 = arith.extui %0 : i1 to i32
    %c0_i32_0 = arith.constant 0 : i32
    %2 = arith.cmpi ne, %1, %c0_i32_0 : i32
    scf.if %2 {
      %cst_12 = arith.constant 0.000000e+00 : f32
      %25 = vector.broadcast %cst_12 : f32 to vector<8x32xf32>
      %c0_13 = arith.constant 0 : index
      %c0_14 = arith.constant 0 : index
      %26 = vector.load %arg5[%c0_13, %c0_14] : memref<8x32xf32, #tpu.memory_space<vmem>>, vector<8x32xf32>
      tpu.vector_store %arg5[%c0_13, %c0_14], %25 {strides = array<i32>} : memref<8x32xf32, #tpu.memory_space<vmem>>, vector<8x32xf32>,
    } else {
    }
    %c0 = arith.constant 0 : index
    %c0_1 = arith.constant 0 : index
    %3 = vector.load %arg2[%c0, %c0_1] : memref<32x32xf32, #tpu.memory_space<vmem>>, vector<32x32xf32>
    %c0_2 = arith.constant 0 : index
    %c0_3 = arith.constant 0 : index
    %4 = vector.load %arg3[%c0_2, %c0_3] : memref<32x32xf32, #tpu.memory_space<vmem>>, vector<32x32xf32>
    %cst = arith.constant dense<0xFF800000> : vector<32xf32>
    %5 = vector.multi_reduction <maximumf>, %3, %cst [1] : vector<32x32xf32> to vector<32xf32>
    %6 = vector.shape_cast %5 : vector<32xf32> to vector<32x1xf32>
    %7 = vector.extract_strided_slice %3 {offsets = [0, 0], sizes = [32, 1], strides = [1, 1]} : vector<32x32xf32> to vector<32x1xf32>
    %8 = arith.cmpf ogt, %6, %7 : vector<32x1xf32>
    %9 = math.log %4 : vector<32x32xf32>
    %10 = math.log %3 : vector<32x32xf32>
    %11 = arith.subf %9, %10 : vector<32x32xf32>
    %12 = arith.mulf %4, %11 : vector<32x32xf32>
    %cst_4 = arith.constant 0.000000e+00 : f32
    %13 = vector.shape_cast %8 : vector<32x1xi1> to vector<32x1xi1>
    %14 = vector.broadcast %13 : vector<32x1xi1> to vector<32x32xi1>
    %15 = vector.broadcast %cst_4 : f32 to vector<32x32xf32>
    %16 = arith.select %14, %12, %15 : vector<32x32xi1>, vector<32x32xf32>
    %c0_5 = arith.constant 0 : index
    %c0_6 = arith.constant 0 : index
    %17 = vector.load %arg5[%c0_5, %c0_6] : memref<8x32xf32, #tpu.memory_space<vmem>>, vector<1x32xf32>
    %cst_7 = arith.constant dense<0.000000e+00> : vector<32xf32>
    %18 = vector.multi_reduction <add>, %16, %cst_7 [0] : vector<32x32xf32> to vector<32xf32>
    %19 = vector.shape_cast %18 : vector<32xf32> to vector<1x32xf32>
    %20 = arith.addf %17, %19 : vector<1x32xf32>
    %c0_8 = arith.constant 0 : index
    %c0_9 = arith.constant 0 : index
    %21 = vector.load %arg5[%c0_8, %c0_9] : memref<8x32xf32, #tpu.memory_space<vmem>>, vector<1x32xf32>
    tpu.vector_store %arg5[%c0_8, %c0_9], %20 {strides = array<i32>} : memref<8x32xf32, #tpu.memory_space<vmem>>, vector<1x32xf32>,
    %c0_i32_10 = arith.constant 0 : i32
    %22 = arith.cmpi eq, %arg1, %c0_i32_10 : i32
    %23 = arith.extui %22 : i1 to i32
    %c0_i32_11 = arith.constant 0 : i32
    %24 = arith.cmpi ne, %23, %c0_i32_11 : i32
    scf.if %24 {
      %c0_12 = arith.constant 0 : index
      %c0_13 = arith.constant 0 : index
      %25 = vector.load %arg5[%c0_12, %c0_13] : memref<8x32xf32, #tpu.memory_space<vmem>>, vector<8x32xf32>
      %26 = vector.shape_cast %25 : vector<8x32xf32> to vector<1x8x32xf32>
      %cst_14 = arith.constant dense<0.000000e+00> : vector<1xf32>
      %27 = vector.multi_reduction <add>, %26, %cst_14 [1, 2] : vector<1x8x32xf32> to vector<1xf32>
      %28 = vector.shape_cast %27 : vector<1xf32> to vector<1x1x1xf32>
      %29 = vector.extract %28[0, 0, 0] : f32 from vector<1x1x1xf32>
      %30 = vector.broadcast %29 : f32 to vector<1x8x128xf32>
      %c0_15 = arith.constant 0 : index
      %c0_16 = arith.constant 0 : index
      %c0_17 = arith.constant 0 : index
      %31 = vector.load %arg4[%c0_15, %c0_16, %c0_17] : memref<1x8x128xf32, #tpu.memory_space<vmem>>, vector<1x8x128xf32>
      tpu.vector_store %arg4[%c0_15, %c0_16, %c0_17], %30 {strides = array<i32>} : memref<1x8x128xf32, #tpu.memory_space<vmem>>, vector<1x8x128xf32>,
    } else {
    }
    return
  }
  func.func @transform_0(%arg0: i32, %arg1: i32) -> (i32, i32) {
    %c1_i32 = arith.constant 1 : i32
    %0 = arith.muli %arg0, %c1_i32 : i32
    %1 = arith.addi %0, %arg1 : i32
    %c0_i32 = arith.constant 0 : i32
    %c0_i32_0 = arith.constant 0 : i32
    return %1, %c0_i32 : i32, i32
  }
  func.func @transform_1(%arg0: i32, %arg1: i32) -> (i32, i32) {
    %c1_i32 = arith.constant 1 : i32
    %0 = arith.muli %arg0, %c1_i32 : i32
    %1 = arith.addi %0, %arg1 : i32
    %c0_i32 = arith.constant 0 : i32
    %c0_i32_0 = arith.constant 0 : i32
    return %1, %c0_i32 : i32, i32
  }
  func.func @transform_2(%arg0: i32, %arg1: i32) -> (i32, i32, i32) {
    %c0_i32 = arith.constant 0 : i32
    %c0_i32_0 = arith.constant 0 : i32
    %c0_i32_1 = arith.constant 0 : i32
    return %arg0, %c0_i32, %c0_i32_0 : i32, i32, i32
  }
}

</mosaic_0001>

<bundles_post_ra>
// kernel: tpu_custom_call.1
= control target key start
LH: loop header
LB: loop body
LE: loop exit
PB: predicated region body
PF: predicated region fallthrough
CT: control target
= control target key end

     0   :  { %7 = vsyncpa [#allocation4], 0  ;;  %s347_s0 = inlined_call_operand.hbm [shape: f32[32,32], index: 0, kind: input, shape index: {}]   ;;  %s348_s1 = inlined_call_operand.hbm [shape: f32[32,32], index: 1, kind: input, shape index: {}]   ;;  %s349_s2 = inlined_call_operand.hbm [shape: f32[1,8,128], index: 2, kind: output, shape index: {}]  }
   0x1   :  { %8 = vsyncpa [#allocation7], 0 }
   0x2   :  { %9 = vsyncpa [#allocation5], 0  ;;  %s279_s9 = smov [#allocation3]   ;;  %s207_s13 = scalar_lea.hbm %s347_s0, 512 }
   0x3   :  { %s19_s10 = sshll.u32 %s279_s9, 4  ;;  %p208_p0 = scmp.ne.s32.totalorder %s347_s0, %s207_s13  ;;  %s20_s10 = int_to_ptr.vmem [resolvable:$true] %s19_s10 }
   0x4   :  { %p211_p1 = scmp.lt.u32.totalorder %s207_s13, %s347_s0 }
   0x6   :  { %p213_p2 = pnand %p211_p1, %p208_p0 }
   0x8   :  { %216 = shalt.err (!%p213_p2)
}
   0x9   :  { %s217_s18 = scalar_lea.vmem %s20_s10, 512  ;;  %p222_p4 = scmp.lt.s32.totalorder %s20_s10, %s20_s10 }
   0xa   :  { %p218_p3 = scmp.ne.s32.totalorder %s20_s10, %s217_s18  ;;  %p223_p5 = scmp.lt.s32.totalorder %s217_s18, %s217_s18 }
   0xc   :  { %p224_p6 = por %p223_p5, %p222_p4 }
   0xe   :  { %p225_p7 = pnand %p224_p6, %p218_p3 }
  0x10   :  { %228 = shalt.err (!%p225_p7)
}
  0x11   :  { %s280_s19 = smov 128   ;;  %s281_s20 = smov 8  }
  0x12   :  { %25 = dma.hbm_to_vmem [thread:$0]  %s347_s0, 512, %s20_s10, [#allocation4], %s280_s19, %s280_s19, %s281_s20  }
  0x13   :  { %s282_s23 = smov [#allocation6]   ;;  %s229_s27 = scalar_lea.hbm %s348_s1, 512 }
  0x14   :  { %s35_s24 = sshll.u32 %s282_s23, 4  ;;  %p230_p8 = scmp.ne.s32.totalorder %s348_s1, %s229_s27  ;;  %s36_s24 = int_to_ptr.vmem [resolvable:$true] %s35_s24 }
  0x15   :  { %p233_p9 = scmp.lt.u32.totalorder %s229_s27, %s348_s1 }
  0x17   :  { %p235_p10 = pnand %p233_p9, %p230_p8 }
  0x19   :  { %238 = shalt.err (!%p235_p10)
}
  0x1a   :  { %s239_s4 = scalar_lea.vmem %s36_s24, 512  ;;  %p244_p12 = scmp.lt.s32.totalorder %s36_s24, %s36_s24 }
  0x1b   :  { %p240_p11 = scmp.ne.s32.totalorder %s36_s24, %s239_s4  ;;  %p245_p13 = scmp.lt.s32.totalorder %s239_s4, %s239_s4 }
  0x1d   :  { %p246_p0 = por %p245_p13, %p244_p12 }
  0x1f   :  { %p247_p1 = pnand %p246_p0, %p240_p11 }
  0x21   :  { %250 = shalt.err (!%p247_p1)
}
  0x22   :  { %41 = dma.hbm_to_vmem [thread:$0]  %s348_s1, 512, %s36_s24, [#allocation7], %s280_s19, %s280_s19, %s281_s20  }
  0x23   :  { %273 = dma.done.wait [#allocation4], 512  }
  0x24   :  { %274 = vsyncadd [#allocation4], 4294966784 }
  0x25   :  { %275 = dma.done.wait [#allocation7], 512  }
  0x26   :  { %276 = vsyncadd [#allocation7], 4294966784  ;;  %v283_v0 = vmov 0   ;;  %vm56_vm0 = vcmask 261120   ;;  %v58_v1 = vld [vmem:[#allocation3] sm:$0xff]  ;;  %v59_v2 = vld [vmem:[#allocation3 + $0x8] sm:$0xff] }
  0x27   :  { %189 = vset.pattern.permute.xlu0 %v283_v0  ;;  %190 = vset.pattern.permute.xlu1 %v283_v0  ;;  %v60_v3 = vld [vmem:[#allocation3 + $0x10] sm:$0xff]  ;;  %v67_v4 = vsel %vm56_vm0, %v58_v1, -inf  ;;  %v61_v6 = vld [vmem:[#allocation3 + $0x18] sm:$0xff]  ;;  %v70_v7 = vsel %vm56_vm0, %v59_v2, -inf  ;;  %v284_v17 = vmov 0.0   ;;  %v63_v18 = vld [vmem:[#allocation6 + $0x8] sm:$0xff]  ;;  %191 = vlog2.f32 %v59_v2 }
  0x28   :  { %v73_v5 = vsel %vm56_vm0, %v60_v3, -inf  ;;  %68 = vmax.xlane.f32.xlu0 %v67_v4  ;;  %v76_v8 = vsel %vm56_vm0, %v61_v6, -inf  ;;  %57 = vst.msk [vmem:[#allocation2] sm:$0xff] %vm56_vm0, %v284_v17  ;;  %v62_v19 = vld [vmem:[#allocation6] sm:$0xff]  ;;  %193 = vlog2.f32 %v63_v18  ;;  %v64_v20 = vld [vmem:[#allocation6 + $0x10] sm:$0xff]  ;;  %v65_v21 = vld [vmem:[#allocation6 + $0x18] sm:$0xff] }
  0x29   :  { %74 = vmax.xlane.f32.xlu1 %v73_v5  ;;  %195 = vlog2.f32 %v58_v1  ;;  %vm146_vm9 = vcmask 253952   ;;  %s285_s1 = smov [#allocation8]  }
  0x2a   :  { %197 = vlog2.f32 %v62_v19  ;;  %s170_s6 = sshll.u32 %s285_s1, 4  ;;  %s171_s6 = int_to_ptr.vmem [resolvable:$true] %s170_s6 }
  0x2b   :  { %199 = vlog2.f32 %v60_v3  ;;  %s251_s8 = scalar_lea.vmem %s171_s6, 128  ;;  %p256_p3 = scmp.lt.s32.totalorder %s171_s6, %s171_s6 }
  0x2c   :  { %71 = vmax.xlane.f32.xlu0 %v70_v7  ;;  %201 = vlog2.f32 %v64_v20  ;;  %p252_p2 = scmp.ne.s32.totalorder %s171_s6, %s251_s8  ;;  %p257_p4 = scmp.lt.s32.totalorder %s251_s8, %s251_s8 }
  0x2d   :  { %77 = vmax.xlane.f32.xlu1 %v76_v8  ;;  %203 = vlog2.f32 %v61_v6 }
  0x2e   :  { %205 = vlog2.f32 %v65_v21  ;;  %p258_p5 = por %p257_p4, %p256_p3 }
  0x30   :  { %p259_p6 = pnand %p258_p5, %p252_p2 }
  0x31   :  { %v192_v22 = vpop.eup %191 }
  0x32   :  { %v194_v23 = vpop.eup %193  ;;  %v94_v28 = vmul.f32 0.6931472, %v192_v22 }
  0x33   :  { %v196_v24 = vpop.eup %195  ;;  %v86_v27 = vmul.f32 0.6931472, %v194_v23 }
  0x34   :  { %v198_v25 = vpop.eup %197  ;;  %v92_v31 = vmul.f32 0.6931472, %v196_v24 }
  0x35   :  { %v200_v26 = vpop.eup %199  ;;  %v84_v30 = vmul.f32 0.6931472, %v198_v25  ;;  %v100_v34 = vsub.f32 %v86_v27, %v94_v28 }
  0x36   :  { %v202_v29 = vpop.eup %201  ;;  %v96_v33 = vmul.f32 0.6931472, %v200_v26 }
  0x37   :  { %v204_v32 = vpop.eup %203  ;;  %v88_v35 = vmul.f32 0.6931472, %v202_v29  ;;  %v99_v37 = vsub.f32 %v84_v30, %v92_v31  ;;  %v104_v39 = vmul.f32 %v100_v34, %v63_v18 }
  0x38   :  { %v206_v36 = vpop.eup %205  ;;  %v98_v42 = vmul.f32 0.6931472, %v204_v32 }
  0x39   :  { %v101_v40 = vsub.f32 %v88_v35, %v96_v33  ;;  %v90_v41 = vmul.f32 0.6931472, %v206_v36  ;;  %v103_v43 = vmul.f32 %v99_v37, %v62_v19 }
  0x3b   :  { %v105_v46 = vmul.f32 %v101_v40, %v64_v20  ;;  %v102_v47 = vsub.f32 %v90_v41, %v98_v42 }
  0x3d   :  { %v106_v52 = vmul.f32 %v102_v47, %v65_v21 }
  0xb5   :  { %v69_v9 = vpop.xlane.xlu0 %68 }
  0xb6   :  { %v75_v10 = vpop.xlane.xlu1 %74  ;;  %vm79_vm1 = vcmp.gt.f32.partialorder %v69_v9, %v58_v1 }
  0xb7   :  { %v107_v11 = vsel %vm79_vm1, 1, %v283_v0  ;;  %vm81_vm3 = vcmp.gt.f32.partialorder %v75_v10, %v60_v3 }
  0xb8   :  { %112 = vperm.xlu0 %189, %v107_v11   ;;  %v109_v15 = vsel %vm81_vm3, 1, %v283_v0 }
  0xb9   :  { %v72_v12 = vpop.xlane.xlu0 %71 }
  0xba   :  { %vm80_vm2 = vcmp.gt.f32.partialorder %v72_v12, %v59_v2  ;;  %v78_v14 = vpop.xlane.xlu1 %77  ;;  %v131_v2 = vld [vmem:[#allocation2] sm:$0x1] }
  0xbb   :  { %v108_v13 = vsel %vm80_vm2, 1, %v283_v0  ;;  %vm82_vm4 = vcmp.gt.f32.partialorder %v78_v14, %v61_v6 }
  0xbc   :  { %115 = vperm.xlu1 %190, %v108_v13   ;;  %v110_v16 = vsel %vm82_vm4, 1, %v283_v0 }
  0xc0   :  { %118 = vperm.xlu1 %190, %v109_v15  }
  0xc4   :  { %121 = vperm.xlu1 %190, %v110_v16  }
 0x137   :  { %v113_v38 = vpop.permute.xlu0 %112 }
 0x138   :  { %vm123_vm5 = vcmp.eq.s32.totalorder %v113_v38, 1 }
 0x139   :  { %v127_v48 = vsel %vm123_vm5, %v103_v43, 0.0 }
 0x13a   :  { %v132_v53 = vsel %vm56_vm0, %v127_v48, 0.0 }
 0x13b   :  { %v116_v44 = vpop.permute.xlu1 %115 }
 0x13c   :  { %vm124_vm6 = vcmp.eq.s32.totalorder %v116_v44, 1 }
 0x13d   :  { %v128_v45 = vsel %vm124_vm6, %v104_v39, 0.0 }
 0x13e   :  { %v133_v50 = vsel %vm56_vm0, %v128_v45, 0.0 }
 0x13f   :  { %v119_v49 = vpop.permute.xlu1 %118  ;;  %v134_v55 = vadd.f32 %v133_v50, %v132_v53 }
 0x140   :  { %vm125_vm7 = vcmp.eq.s32.totalorder %v119_v49, 1 }
 0x141   :  { %v129_v51 = vsel %vm125_vm7, %v105_v46, 0.0 }
 0x142   :  { %v135_v54 = vsel %vm56_vm0, %v129_v51, 0.0 }
 0x143   :  { %v122_v56 = vpop.permute.xlu1 %121  ;;  %v136_v57 = vadd.f32 %v135_v54, %v134_v55 }
 0x144   :  { %vm126_vm8 = vcmp.eq.s32.totalorder %v122_v56, 1 }
 0x145   :  { %v130_v58 = vsel %vm126_vm8, %v106_v52, 0.0 }
 0x146   :  { %v137_v59 = vsel %vm56_vm0, %v130_v58, 0.0 }
 0x147   :  { %v138_v60 = vadd.f32 %v137_v59, %v136_v57 }
 0x149   :  { %v139_v61 = vrot.slane %v138_v60, 4 }
 0x14b   :  { %v140_v62 = vadd.f32 %v139_v61, %v138_v60 }
 0x14d   :  { %v141_v63 = vrot.slane %v140_v62, 2 }
 0x14f   :  { %v142_v0 = vadd.f32 %v141_v63, %v140_v62 }
 0x151   :  { %v143_v1 = vrot.slane %v142_v0, 1 }
 0x153   :  { %v144_v3 = vadd.f32 %v143_v1, %v142_v0 }
 0x155   :  { %v145_v4 = vadd.f32 %v144_v3, %v131_v2 }
 0x157   :  { %147 = vst.msk [vmem:[#allocation2] sm:$0x1] %vm146_vm9, %v145_v4 }
 0x15e   :  { %v151_v5 = vld [vmem:[#allocation2] sm:$0xff] }
 0x15f   :  { %v152_v6 = vsel %vm56_vm0, %v151_v5, 0.0 }
 0x160   :  { %153 = vadd.xlane.f32.xlu1 %v152_v6 }
 0x1ed   :  { %v154_v7 = vpop.xlane.xlu1 %153 }
 0x1ee   :  { %v155_v8 = vrot.slane %v154_v7, 4 }
 0x1f0   :  { %v156_v9 = vadd.f32 %v155_v8, %v154_v7 }
 0x1f2   :  { %v157_v10 = vrot.slane %v156_v9, 2 }
 0x1f4   :  { %v158_v11 = vadd.f32 %v157_v10, %v156_v9 }
 0x1f6   :  { %v159_v12 = vrot.slane %v158_v11, 1 }
 0x1f8   :  { %v160_v13 = vadd.f32 %v159_v12, %v158_v11 }
 0x1fa   :  { %180 = vpush %v160_v13 }
 0x22b   :  { %s181_s7 = spop %180 }
 0x22c   :  { %v162_v14 = vstv %s181_s7 }
 0x22d   :  { %163 = vst [vmem:[#allocation8] sm:$0xff] %v162_v14 }
 0x22e   :  { %262 = shalt.err (!%p259_p6)
}
 0x22f   :  { %s263_s11 = scalar_lea.hbm %s349_s2, 128 }
 0x230   :  { %p264_p7 = scmp.ne.s32.totalorder %s349_s2, %s263_s11  ;;  %p267_p8 = scmp.lt.u32.totalorder %s263_s11, %s349_s2 }
 0x232   :  { %p269_p9 = pnand %p267_p8, %p264_p7 }
 0x234   :  { %272 = shalt.err (!%p269_p9)
}
 0x235   :  { %173 = dma.vmem_to_hbm [thread:$0]  %s171_s6, 128, %s349_s2, [#allocation5]  }
 0x236   :  { %277 = dma.done.wait [#allocation5], 128  }
 0x237   :  { %278 = vsyncadd [#allocation5], 4294967168 }
 0x238   :  { %177 = vsyncpa [#allocation4], 1 }
 0x239   :  { %178 = vsyncpa [#allocation7], 1 }
 0x23a   :  { %179 = vsyncpa [#allocation5], 1 }

</bundles_post_ra>
